<compile_context>
chip_gen: v5e
topology: v5e:2x2
jax: 0.10.0
libtpu: 0.0.40
codegen_flags: <defaults>
</compile_context>

<pallas_src>
import jax
import jax.numpy as jnp
from jax.experimental import pallas as pl
from jax.experimental.pallas import tpu as pltpu

_LANES = 512                   # lane-dense slab width (multiple of 128)
_TILE_BYTES = 2 * 1024 * 1024  # per-input tile budget (2 in x 2 buf = 8 MiB, fits v5e)


def _smooth_l1(pred, gt):
    # PyTorch SmoothL1Loss, beta = 1.0: 0.5*d^2 if |d| < 1 else |d| - 0.5
    diff = pred - gt
    ad = jnp.abs(diff)
    return jnp.where(ad < 1.0, 0.5 * diff * diff, ad - 0.5)


def _make_kernel(tr, fr, lanes, rows):
    needs_row_mask = (rows % tr) != 0

    def kernel(pred_ref, gt_ref, sum_ref, cnt_ref):
        # stream in native dtype, cast on the VPU (hidden under DMA)
        pred = pred_ref[...].astype(jnp.float32)
        gt = gt_ref[...].astype(jnp.float32)

        mask = gt > 0.0
        if needs_row_mask:
            # last block reads past the end of the array -> mask those rows out
            i = pl.program_id(0)
            row = jax.lax.broadcasted_iota(jnp.int32, (tr, lanes), 0)
            mask = jnp.logical_and(mask, (i * tr + row) < rows)

        sl1 = jnp.where(mask, _smooth_l1(pred, gt), 0.0)
        cnt = mask.astype(jnp.float32)

        # fold the (tr, lanes) tile down to (fr, lanes) with pure element-wise
        # (VPU) adds; the cross-lane reduce happens once, in the wrapper.
        sum_ref[...] = jnp.sum(sl1.reshape(tr // fr, fr, lanes), axis=0)[None]
        cnt_ref[...] = jnp.sum(cnt.reshape(tr // fr, fr, lanes), axis=0)[None]

    return kernel


def _masked_sl1_partials(pred2d, gt2d, tr, fr, lanes, rows):
    num_blocks = -(-rows // tr)
    kernel = _make_kernel(tr, fr, lanes, rows)
    return pl.pallas_call(
        kernel,
        out_shape=(
            jax.ShapeDtypeStruct((num_blocks, fr, lanes), jnp.float32),
            jax.ShapeDtypeStruct((num_blocks, fr, lanes), jnp.float32),
        ),
        grid_spec=pltpu.PrefetchScalarGridSpec(
            num_scalar_prefetch=0,
            grid=(num_blocks,),
            in_specs=[
                pl.BlockSpec((tr, lanes), lambda i: (i, 0)),
                pl.BlockSpec((tr, lanes), lambda i: (i, 0)),
            ],
            out_specs=[
                pl.BlockSpec((1, fr, lanes), lambda i: (i, 0, 0)),
                pl.BlockSpec((1, fr, lanes), lambda i: (i, 0, 0)),
            ],
        ),
        compiler_params=pltpu.CompilerParams(
            dimension_semantics=("parallel",)),
    )(pred2d, gt2d)


def sl1_loss(depth_pred, depth_gt):
    """loss = SmoothL1(pred[gt>0], gt[gt>0], reduction='mean') * 2**(1-2)."""
    pred = depth_pred.reshape(-1)   # row-major contiguous -> free reshape
    gt = depth_gt.reshape(-1)
    n = pred.shape[0]

    lanes = _LANES if n >= _LANES else n   # tiny input: single full-width row
    rows = n // lanes
    main = rows * lanes

    # row-tile size: fill ~_TILE_BYTES per input, multiple of 8 sublanes
    itemsize = jnp.dtype(pred.dtype).itemsize
    if rows >= 8:
        tr = max(8, min((rows // 8) * 8,
                        (_TILE_BYTES // (lanes * itemsize) // 8) * 8))
        fr = 8
    else:
        tr = rows
        fr = rows

    if main == n:
        pred_main, gt_main = pred, gt        # pure reshape below, no pad / no copy
    else:
        pred_main, gt_main = pred[:main], gt[:main]

    sum_parts, cnt_parts = _masked_sl1_partials(
        pred_main.reshape(rows, lanes), gt_main.reshape(rows, lanes),
        tr, fr, lanes, rows)

    total = jnp.sum(sum_parts)
    count = jnp.sum(cnt_parts)

    if main < n:
        # <512-element tail handled in plain JAX (avoids padding the full arrays)
        tp = pred[main:].astype(jnp.float32)
        tg = gt[main:].astype(jnp.float32)
        tmask = tg > 0.0
        total = total + jnp.sum(jnp.where(tmask, _smooth_l1(tp, tg), 0.0))
        count = count + jnp.sum(tmask.astype(jnp.float32))

    # NOTE: if no pixel has gt > 0, this yields nan/inf, matching PyTorch's
    # mean over an empty selection.
    return 0.5 * total / count


def _sl1_loss_ref(depth_pred, depth_gt):
    pred = depth_pred.astype(jnp.float32)
    gt = depth_gt.astype(jnp.float32)
    mask = gt > 0.0
    sl1 = jnp.where(mask, _smooth_l1(pred, gt), 0.0)
    return 0.5 * jnp.sum(sl1) / jnp.sum(mask.astype(jnp.float32))


if __name__ == "__main__":
    key = jax.random.PRNGKey(0)

    def make_case(k, shape, dtype):
        k1, k2 = jax.random.split(k)
        # gt in [-0.5, 2.0): some values <= 0 so the mask actually drops elements
        gt = jax.random.uniform(k1, shape, jnp.float32, -0.5, 2.0)
        pred = gt + 0.8 * jax.random.normal(k2, shape, jnp.float32)
        return pred.astype(dtype), gt.astype(dtype)

    cases = [
        ((2, 16, 16), jnp.float32),   # tiny: single block, rows < 8
        ((2, 64, 64), jnp.float32),   # clean: multi-row tile, no mask / no tail
        ((2, 45, 59), jnp.float32),   # ragged: row-masked last block + JAX tail
        ((2, 64, 80), jnp.bfloat16),  # native-dtype streaming, in-kernel f32 cast
    ]

    loss_fn = jax.jit(sl1_loss)
    keys = jax.random.split(key, len(cases))
    for k, (shape, dtype) in zip(keys, cases):
        pred, gt = make_case(k, shape, dtype)
        loss = jax.block_until_ready(loss_fn(pred, gt))
        ref = _sl1_loss_ref(pred, gt)
        assert jnp.allclose(loss, ref, rtol=1e-4, atol=1e-6), (shape, dtype, loss, ref)

    print("KERNEL_OK")
</pallas_src>

<mosaic_0001>
module attributes {stable_mosaic.version = 11 : i64} {
  func.func @kernel(%arg0: i32, %arg1: memref<1x512xf32, #tpu.memory_space<vmem>>, %arg2: memref<1x512xf32, #tpu.memory_space<vmem>>, %arg3: memref<1x1x512xf32, #tpu.memory_space<vmem>>, %arg4: memref<1x1x512xf32, #tpu.memory_space<vmem>>) attributes {dimension_semantics = [#tpu.dimension_semantics<parallel>], iteration_bounds = array<i64: 1>, scalar_prefetch = 0 : i64, scratch_operands = 0 : i64, tpu.core_type = #tpu.core_type<tc>, window_params = [{transform_indices = @transform_0, window_bounds = array<i64: 1, 512>}, {transform_indices = @transform_1, window_bounds = array<i64: 1, 512>}, {transform_indices = @transform_2, window_bounds = array<i64: 1, 1, 512>}, {transform_indices = @transform_3, window_bounds = array<i64: 1, 1, 512>}]} {
    %c0 = arith.constant 0 : index
    %c0_0 = arith.constant 0 : index
    %0 = vector.load %arg1[%c0, %c0_0] : memref<1x512xf32, #tpu.memory_space<vmem>>, vector<1x512xf32>
    %c0_1 = arith.constant 0 : index
    %c0_2 = arith.constant 0 : index
    %1 = vector.load %arg2[%c0_1, %c0_2] : memref<1x512xf32, #tpu.memory_space<vmem>>, vector<1x512xf32>
    %cst = arith.constant 0.000000e+00 : f32
    %2 = vector.broadcast %cst : f32 to vector<1x512xf32>
    %3 = arith.cmpf ogt, %1, %2 : vector<1x512xf32>
    %4 = arith.subf %0, %1 : vector<1x512xf32>
    %5 = math.absf %4 : vector<1x512xf32>
    %cst_3 = arith.constant 1.000000e+00 : f32
    %6 = vector.broadcast %cst_3 : f32 to vector<1x512xf32>
    %7 = arith.cmpf olt, %5, %6 : vector<1x512xf32>
    %cst_4 = arith.constant 5.000000e-01 : f32
    %8 = vector.broadcast %cst_4 : f32 to vector<1x512xf32>
    %9 = arith.mulf %8, %4 : vector<1x512xf32>
    %10 = arith.mulf %9, %4 : vector<1x512xf32>
    %cst_5 = arith.constant 5.000000e-01 : f32
    %11 = vector.broadcast %cst_5 : f32 to vector<1x512xf32>
    %12 = arith.subf %5, %11 : vector<1x512xf32>
    %13 = arith.select %7, %10, %12 : vector<1x512xi1>, vector<1x512xf32>
    %cst_6 = arith.constant 0.000000e+00 : f32
    %14 = vector.broadcast %cst_6 : f32 to vector<1x512xf32>
    %15 = arith.select %3, %13, %14 : vector<1x512xi1>, vector<1x512xf32>
    %16 = arith.extui %3 : vector<1x512xi1> to vector<1x512xi32>
    %17 = arith.sitofp %16 : vector<1x512xi32> to vector<1x512xf32>
    %18 = vector.shape_cast %15 : vector<1x512xf32> to vector<1x1x512xf32>
    %cst_7 = arith.constant dense<0.000000e+00> : vector<1x512xf32>
    %19 = vector.multi_reduction <add>, %18, %cst_7 [0] : vector<1x1x512xf32> to vector<1x512xf32>
    %20 = vector.shape_cast %19 : vector<1x512xf32> to vector<1x1x512xf32>
    %c0_8 = arith.constant 0 : index
    %c0_9 = arith.constant 0 : index
    %c0_10 = arith.constant 0 : index
    %21 = vector.load %arg3[%c0_8, %c0_9, %c0_10] : memref<1x1x512xf32, #tpu.memory_space<vmem>>, vector<1x1x512xf32>
    tpu.vector_store %arg3[%c0_8, %c0_9, %c0_10], %20 {strides = array<i32>} : memref<1x1x512xf32, #tpu.memory_space<vmem>>, vector<1x1x512xf32>,
    %22 = vector.shape_cast %17 : vector<1x512xf32> to vector<1x1x512xf32>
    %cst_11 = arith.constant dense<0.000000e+00> : vector<1x512xf32>
    %23 = vector.multi_reduction <add>, %22, %cst_11 [0] : vector<1x1x512xf32> to vector<1x512xf32>
    %24 = vector.shape_cast %23 : vector<1x512xf32> to vector<1x1x512xf32>
    %c0_12 = arith.constant 0 : index
    %c0_13 = arith.constant 0 : index
    %c0_14 = arith.constant 0 : index
    %25 = vector.load %arg4[%c0_12, %c0_13, %c0_14] : memref<1x1x512xf32, #tpu.memory_space<vmem>>, vector<1x1x512xf32>
    tpu.vector_store %arg4[%c0_12, %c0_13, %c0_14], %24 {strides = array<i32>} : memref<1x1x512xf32, #tpu.memory_space<vmem>>, vector<1x1x512xf32>,
    return
  }
  func.func @transform_0(%arg0: i32) -> (i32, i32) {
    %c0_i32 = arith.constant 0 : i32
    %c0_i32_0 = arith.constant 0 : i32
    return %arg0, %c0_i32 : i32, i32
  }
  func.func @transform_1(%arg0: i32) -> (i32, i32) {
    %c0_i32 = arith.constant 0 : i32
    %c0_i32_0 = arith.constant 0 : i32
    return %arg0, %c0_i32 : i32, i32
  }
  func.func @transform_2(%arg0: i32) -> (i32, i32, i32) {
    %c0_i32 = arith.constant 0 : i32
    %c0_i32_0 = arith.constant 0 : i32
    %c0_i32_1 = arith.constant 0 : i32
    return %arg0, %c0_i32, %c0_i32_0 : i32, i32, i32
  }
  func.func @transform_3(%arg0: i32) -> (i32, i32, i32) {
    %c0_i32 = arith.constant 0 : i32
    %c0_i32_0 = arith.constant 0 : i32
    %c0_i32_1 = arith.constant 0 : i32
    return %arg0, %c0_i32, %c0_i32_0 : i32, i32, i32
  }
}

</mosaic_0001>

<bundles_post_ra>
// kernel: sl1_loss.1
= control target key start
LH: loop header
LB: loop body
LE: loop exit
PB: predicated region body
PF: predicated region fallthrough
CT: control target
= control target key end

     0   :  { %v27_v0 = vlaneseq  ;;  %v45_v4 = vmov 0.0   ;;  %s78_s0 = inlined_call_operand.vmem [shape: f32[1,512], index: 0, kind: input, shape index: {}]   ;;  %s79_s1 = inlined_call_operand.vmem [shape: f32[1,512], index: 1, kind: input, shape index: {}]   ;;  %s80_s3 = inlined_call_operand.vmem [shape: f32[1,1,512], index: 3, kind: output, shape index: {1}]   ;;  %s81_s2 = inlined_call_operand.vmem [shape: f32[1,1,512], index: 2, kind: output, shape index: {0}]  }
   0x1   :  { %v13_v1 = vld [vmem:[%s78_s0] sm:$0xf] }
   0x2   :  { %v14_v2 = vld [vmem:[%s79_s1] sm:$0xf]  ;;  %vm29_vm1 = vcmp.lt.s32.totalorder %v27_v0, 512 }
   0x3   :  { %vm15_vm0 = vcmp.gt.f32.partialorder %v14_v2, 0.0  ;;  %v16_v3 = vsub.f32 %v13_v1, %v14_v2 }
   0x4   :  { %v43_v5 = vsel %vm15_vm0, 1.0, %v45_v4 }
   0x5   :  { %v17_v6 = vand.u32 2147483647, %v16_v3  ;;  %v19_v7 = vmul.f32 0.5, %v16_v3  ;;  %33 = vst.msk [vmem:[%s80_s3] sm:$0xf] %vm29_vm1, %v43_v5 }
   0x7   :  { %vm18_vm2 = vcmp.lt.f32.partialorder %v17_v6, 1.0  ;;  %v20_v8 = vmul.f32 %v19_v7, %v16_v3  ;;  %v42_v9 = vadd.f32 -0.5, %v17_v6 }
   0x9   :  { %v22_v10 = vsel %vm18_vm2, %v20_v8, %v42_v9 }
   0xa   :  { %v23_v11 = vsel %vm15_vm0, %v22_v10, 0.0 }
   0xb   :  { %31 = vst.msk [vmem:[%s81_s2] sm:$0xf] %vm29_vm1, %v23_v11 }

</bundles_post_ra>
